<compile_context>
chip_gen: v7x
topology: tpu7x:2x2x1
jax: 0.10.0
libtpu: 0.0.40
codegen_flags: <defaults>
</compile_context>

<pallas_src>
from functools import partial

import jax
import jax.numpy as jnp
from jax.experimental import pallas as pl
from jax.experimental.pallas import tpu as pltpu

# ---- synthetic hparams (deterministic, small) -------------------------------
UPSAMPLE_SCALES = (2, 2)          # hparams.upsample_scales
FREQ_AXIS_KERNEL_SIZE = 3         # hparams.freq_axis_kernel_size
NEG_SLOPE = 0.4                   # LeakyReLU slope

_ROW_HALO = 8                     # aligned freq halo inside the VMEM scratch (>= pf)
_LANE = 128                       # TPU lane width; time tiles stay multiples of this
_VMEM_BUDGET = 12 * 1024 * 1024   # soft per-step footprint budget (v7x-safe)


# ---- fused Pallas kernel -----------------------------------------------------
def _fused_upsample_kernel(x_ref, *refs, kf, pf, scales, neg_slope):
    """Fused chain of ConvTranspose2d(1,1,(kf,s),stride=(1,s)) + LeakyReLU.

    x_ref   : (F, Tt)          input tile, time on lanes            (VMEM)
    refs    : w_0, b_0, ..., w_{L-1}, b_{L-1}, o_ref, pad_ref
      w_i   : (kf * s_i,)      flattened weight-normed kernel       (SMEM)
      b_i   : (1,)             bias                                 (SMEM)
      o_ref : (P, F, Tt)       one lane-dense plane per final phase (VMEM)
      pad   : (F+2*HALO, Tt)   zero-padded scratch plane            (VMEM scratch)
    """
    *wb, o_ref, pad_ref = refs
    n_layers = len(scales)
    F, Tt = x_ref.shape

    # Zero ONLY the aligned halo chunks (rows [0,HALO) and [F+HALO, F+2*HALO)).
    # Interior rows [HALO, HALO+F) are overwritten by every freq_taps() store,
    # so a full-plane memset would just burn vst slots.  The halo rows are
    # never written, so they stay zero == the conv's zero padding along freq.
    zeros_halo = jnp.zeros((_ROW_HALO, Tt), jnp.float32)
    pad_ref[pl.ds(0, _ROW_HALO), :] = zeros_halo
    pad_ref[pl.ds(F + _ROW_HALO, _ROW_HALO), :] = zeros_halo

    def freq_taps(plane):
        # One aligned interior store, then (kf-1) frequency-shifted loads.
        # Tap kh reads plane[f + pf - kh] with zeros outside [0, F).  The
        # center tap (kh == pf) is exactly `plane` -- never reloaded.
        pad_ref[pl.ds(_ROW_HALO, F), :] = plane
        taps = []
        for kh in range(kf):
            if kh == pf:
                taps.append(plane)
            else:
                taps.append(pad_ref[pl.ds(_ROW_HALO + pf - kh, F), :])
        return taps

    def emit(layer, plane, phase):
        if layer == n_layers:
            o_ref[phase] = plane.astype(o_ref.dtype)      # (F, Tt) lane-dense store
            return
        s = scales[layer]
        w_ref = wb[2 * layer]
        b_ref = wb[2 * layer + 1]
        # Taps materialized as VALUES before recursing (the next layer's
        # freq_taps overwrites pad_ref) -- keep this ordering invariant.
        taps = freq_taps(plane)
        for k in range(s):                      # time phase of this layer
            acc = taps[0] * w_ref[k]            # SMEM scalar x vector (VPU)
            for kh in range(1, kf):
                acc = acc + taps[kh] * w_ref[kh * s + k]
            acc = acc + b_ref[0]
            # LeakyReLU(0.4): max(x, 0.4*x) == where(x>=0, x, 0.4*x) for 0<slope<1,
            # but costs one VALU op instead of cmp+select.
            y = jnp.maximum(acc, neg_slope * acc)
            emit(layer + 1, y, phase * s + k)

    emit(0, x_ref[...].astype(jnp.float32), 0)


# ---- wrapper -----------------------------------------------------------------
def _pick_time_tile(T_pad, B, F, P):
    """Largest lane-multiple tile dividing T_pad that fits the VMEM budget and
    leaves >= 2 parallel grid blocks (so both v7x TensorCores get work)."""
    def footprint(tt):
        # double-buffered input + double-buffered (P,F,tt) output + pad scratch
        return 4 * tt * (2 * F + 2 * P * F + (F + 2 * _ROW_HALO))

    tt = _LANE
    for cand in (8192, 4096, 2048, 1024, 512, 256, 128):
        if T_pad % cand == 0 and footprint(cand) <= _VMEM_BUDGET:
            tt = cand
            break
    # v7x megacore: guarantee >= 2 blocks across the two "parallel" grid axes.
    while tt > _LANE and B * (T_pad // tt) < 2:
        tt //= 2
    return tt


def upsample_conv(c, params, *, scales=UPSAMPLE_SCALES, kf=FREQ_AXIS_KERNEL_SIZE):
    """c: (B, 1, F, T) f32 (NCHW, 1 channel) -> (B, 1, F, T * prod(scales)) f32."""
    B, C, F, T = c.shape
    assert C == 1
    pf = (kf - 1) // 2
    assert pf <= _ROW_HALO
    P = 1
    for s in scales:
        P *= s

    x = c[:, 0]                                   # (B, F, T), time on lanes
    # Ragged T: pad time to a lane multiple so every block is lane-dense
    # (no masked vst.msk partial stores).  The conv mixes frequency only, so the
    # padded tail cannot contaminate valid outputs; it is cropped below.
    T_pad = ((T + _LANE - 1) // _LANE) * _LANE
    if T_pad != T:
        x = jnp.pad(x, ((0, 0), (0, 0), (0, T_pad - T)))

    Tt = _pick_time_tile(T_pad, B, F, P)
    grid = (B, T_pad // Tt)

    flat_inputs = [x]
    in_specs = [pl.BlockSpec((pl.Squeezed(), F, Tt), lambda b, t: (b, 0, t))]
    for w, bias in params:
        flat_inputs += [w.reshape(-1), bias]      # weights & bias read as SMEM scalars
        in_specs += [pl.BlockSpec(memory_space=pltpu.MemorySpace.SMEM),
                     pl.BlockSpec(memory_space=pltpu.MemorySpace.SMEM)]

    # Advisory cost hint so XLA can overlap neighbors with this mem-bound call.
    flops = 0
    up = 1
    for s in scales:
        up *= s
        flops += 2 * kf * B * F * T_pad * up
    cost = pl.CostEstimate(flops=flops, transcendentals=0,
                           bytes_accessed=4 * B * F * T_pad * (1 + P))

    kernel = partial(_fused_upsample_kernel, kf=kf, pf=pf,
                     scales=tuple(scales), neg_slope=NEG_SLOPE)
    out = pl.pallas_call(
        kernel,
        out_shape=jax.ShapeDtypeStruct((B, P, F, T_pad), jnp.float32),
        grid=grid,
        in_specs=in_specs,
        out_specs=pl.BlockSpec((pl.Squeezed(), P, F, Tt),
                               lambda b, t: (b, 0, 0, t)),
        scratch_shapes=[pltpu.VMEM((F + 2 * _ROW_HALO, Tt), jnp.float32)],
        compiler_params=pltpu.CompilerParams(
            dimension_semantics=("parallel", "parallel"),
            vmem_limit_bytes=32 * 1024 * 1024),
        cost_estimate=cost,
    )(*flat_inputs)

    # TODO(synk): emitting the phase-interleaved (B, F, T*P) slab directly from
    # the kernel needs an in-register lane interleave ((F,Tt,P)->(F,Tt*P)
    # relayout / element-repeat) that Mosaic does not reliably lower; per the
    # review's fallback we keep the phase-planar kernel output and do the
    # interleave here (in a real model, fuse this transpose into the consumer).
    out = out[:, :, :, :T]                        # crop ragged-T padding
    # (B, P, F, T) -> (B, F, T, P) -> (B, F, T*P): final time index = t*P + p,
    # which matches chaining the per-layer polyphase maps t -> t*s + k.
    y = jnp.transpose(out, (0, 2, 3, 1)).reshape(B, F, T * P)
    return y[:, None]                             # back to NCHW, 1 channel


# ---- parameter setup (weight_norm reparameterization done here, in JAX glue) --
def make_params(key):
    params = []
    for s in UPSAMPLE_SCALES:
        key, kv, kg, kb = jax.random.split(key, 4)
        # ConvTranspose2d weight v: (in_ch=1, out_ch=1, Kf, s); weight_norm dim=0
        v = 0.5 * jax.random.normal(kv, (1, 1, FREQ_AXIS_KERNEL_SIZE, s), jnp.float32)
        g = 1.0 + 0.1 * jax.random.normal(kg, (1, 1, 1, 1), jnp.float32)
        b = 0.1 * jax.random.normal(kb, (1,), jnp.float32)
        norm = jnp.sqrt(jnp.sum(v * v, axis=(1, 2, 3), keepdims=True))
        w_eff = (g * v / norm)[0, 0]              # (Kf, s)
        params.append((w_eff, b))
    return params


# ---- pure-JAX reference (layer-by-layer, same math, no Pallas) ----------------
def _layer_ref(x, w, b, s, kf):
    B, F, T = x.shape
    pf = (kf - 1) // 2
    xp = jnp.pad(x, ((0, 0), (pf, pf), (0, 0)))
    sh = jnp.stack([xp[:, 2 * pf - kh: 2 * pf - kh + F, :] for kh in range(kf)], 0)
    y = jnp.einsum('kbft,ks->bfts', sh, w) + b[0]
    y = jnp.where(y >= 0, y, NEG_SLOPE * y)
    return y.reshape(B, F, T * s)


def _ref_forward(c, params):
    xr = c[:, 0]
    for (w, b), s in zip(params, UPSAMPLE_SCALES):
        xr = _layer_ref(xr, w, b, s, FREQ_AXIS_KERNEL_SIZE)
    return xr[:, None]


if __name__ == "__main__":
    key = jax.random.PRNGKey(0)
    kparams, kx1, kx2 = jax.random.split(key, 3)
    params = make_params(kparams)

    total_up = 1
    for s in UPSAMPLE_SCALES:
        total_up *= s

    # Small, ragged-T shape: exercises the pad-to-128 path (T_pad = 128, grid (2,1)).
    B, F, T = 2, 16, 8
    c = jax.random.normal(kx1, (B, 1, F, T), jnp.float32)     # NCHW, 1 channel
    out = jax.block_until_ready(upsample_conv(c, params))
    assert out.shape == (B, 1, F, T * total_up), out.shape
    assert jnp.allclose(out, _ref_forward(c, params), atol=1e-5, rtol=1e-5)

    # Larger time extent: multi-block lane-dense path, Tt = 128, grid = (2, 3),
    # both axes parallel.
    B2, F2, T2 = 2, 16, 384
    c2 = jax.random.normal(kx2, (B2, 1, F2, T2), jnp.float32)
    out2 = jax.block_until_ready(upsample_conv(c2, params))
    assert out2.shape == (B2, 1, F2, T2 * total_up), out2.shape
    assert jnp.allclose(out2, _ref_forward(c2, params), atol=1e-5, rtol=1e-5)

    print("KERNEL_OK")
</pallas_src>

<mosaic_0001>
module attributes {stable_mosaic.version = 11 : i64} {
  func.func @_fused_upsample_kernel(%arg0: i32, %arg1: i32, %arg2: memref<1x16x128xf32, #tpu.memory_space<vmem>>, %arg3: memref<6xf32, #tpu.memory_space<smem>>, %arg4: memref<1xf32, #tpu.memory_space<smem>>, %arg5: memref<6xf32, #tpu.memory_space<smem>>, %arg6: memref<1xf32, #tpu.memory_space<smem>>, %arg7: memref<1x4x16x128xf32, #tpu.memory_space<vmem>>, %arg8: memref<32x128xf32, #tpu.memory_space<vmem>>) attributes {dimension_semantics = [#tpu.dimension_semantics<parallel>, #tpu.dimension_semantics<parallel>], iteration_bounds = array<i64: 2, 1>, scalar_prefetch = 0 : i64, scratch_operands = 1 : i64, tpu.core_type = #tpu.core_type<tc>, window_params = [{transform_indices = @transform_0, window_bounds = array<i64: 1, 16, 128>}, {transform_indices = @transform_1, window_bounds = array<i64: 6>}, {transform_indices = @transform_2, window_bounds = array<i64: 1>}, {transform_indices = @transform_3, window_bounds = array<i64: 6>}, {transform_indices = @transform_4, window_bounds = array<i64: 1>}, {transform_indices = @transform_5, window_bounds = array<i64: 1, 4, 16, 128>}]} {
    %cst = arith.constant 0.000000e+00 : f32
    %0 = vector.broadcast %cst : f32 to vector<8x128xf32>
    %c0 = arith.constant 0 : index
    %c0_0 = arith.constant 0 : index
    %1 = vector.load %arg8[%c0, %c0_0] : memref<32x128xf32, #tpu.memory_space<vmem>>, vector<8x128xf32>
    tpu.vector_store %arg8[%c0, %c0_0], %0 {strides = array<i32>} : memref<32x128xf32, #tpu.memory_space<vmem>>, vector<8x128xf32>,
    %c24 = arith.constant 24 : index
    %c0_1 = arith.constant 0 : index
    %2 = vector.load %arg8[%c24, %c0_1] : memref<32x128xf32, #tpu.memory_space<vmem>>, vector<8x128xf32>
    tpu.vector_store %arg8[%c24, %c0_1], %0 {strides = array<i32>} : memref<32x128xf32, #tpu.memory_space<vmem>>, vector<8x128xf32>,
    %c0_2 = arith.constant 0 : index
    %c0_3 = arith.constant 0 : index
    %c0_4 = arith.constant 0 : index
    %3 = vector.load %arg2[%c0_2, %c0_3, %c0_4] : memref<1x16x128xf32, #tpu.memory_space<vmem>>, vector<1x16x128xf32>
    %4 = vector.shape_cast %3 : vector<1x16x128xf32> to vector<16x128xf32>
    %c8 = arith.constant 8 : index
    %c0_5 = arith.constant 0 : index
    %5 = vector.load %arg8[%c8, %c0_5] : memref<32x128xf32, #tpu.memory_space<vmem>>, vector<16x128xf32>
    tpu.vector_store %arg8[%c8, %c0_5], %4 {strides = array<i32>} : memref<32x128xf32, #tpu.memory_space<vmem>>, vector<16x128xf32>,
    %c9 = arith.constant 9 : index
    %c0_6 = arith.constant 0 : index
    %6 = vector.load %arg8[%c9, %c0_6] : memref<32x128xf32, #tpu.memory_space<vmem>>, vector<16x128xf32>
    %c7 = arith.constant 7 : index
    %c0_7 = arith.constant 0 : index
    %7 = vector.load %arg8[%c7, %c0_7] : memref<32x128xf32, #tpu.memory_space<vmem>>, vector<16x128xf32>
    %c0_8 = arith.constant 0 : index
    %8 = memref.load %arg3[%c0_8] : memref<6xf32, #tpu.memory_space<smem>>
    %9 = vector.broadcast %8 : f32 to vector<16x128xf32>
    %10 = arith.mulf %6, %9 : vector<16x128xf32>
    %c2 = arith.constant 2 : index
    %11 = memref.load %arg3[%c2] : memref<6xf32, #tpu.memory_space<smem>>
    %12 = vector.broadcast %11 : f32 to vector<16x128xf32>
    %13 = arith.mulf %4, %12 : vector<16x128xf32>
    %14 = arith.addf %10, %13 : vector<16x128xf32>
    %c4 = arith.constant 4 : index
    %15 = memref.load %arg3[%c4] : memref<6xf32, #tpu.memory_space<smem>>
    %16 = vector.broadcast %15 : f32 to vector<16x128xf32>
    %17 = arith.mulf %7, %16 : vector<16x128xf32>
    %18 = arith.addf %14, %17 : vector<16x128xf32>
    %c0_9 = arith.constant 0 : index
    %19 = memref.load %arg4[%c0_9] : memref<1xf32, #tpu.memory_space<smem>>
    %20 = vector.broadcast %19 : f32 to vector<16x128xf32>
    %21 = arith.addf %18, %20 : vector<16x128xf32>
    %cst_10 = arith.constant 4.000000e-01 : f32
    %22 = vector.broadcast %cst_10 : f32 to vector<16x128xf32>
    %23 = arith.mulf %22, %21 : vector<16x128xf32>
    %24 = arith.maximumf %21, %23 : vector<16x128xf32>
    %c8_11 = arith.constant 8 : index
    %c0_12 = arith.constant 0 : index
    %25 = vector.load %arg8[%c8_11, %c0_12] : memref<32x128xf32, #tpu.memory_space<vmem>>, vector<16x128xf32>
    tpu.vector_store %arg8[%c8_11, %c0_12], %24 {strides = array<i32>} : memref<32x128xf32, #tpu.memory_space<vmem>>, vector<16x128xf32>,
    %c9_13 = arith.constant 9 : index
    %c0_14 = arith.constant 0 : index
    %26 = vector.load %arg8[%c9_13, %c0_14] : memref<32x128xf32, #tpu.memory_space<vmem>>, vector<16x128xf32>
    %c7_15 = arith.constant 7 : index
    %c0_16 = arith.constant 0 : index
    %27 = vector.load %arg8[%c7_15, %c0_16] : memref<32x128xf32, #tpu.memory_space<vmem>>, vector<16x128xf32>
    %c0_17 = arith.constant 0 : index
    %28 = memref.load %arg5[%c0_17] : memref<6xf32, #tpu.memory_space<smem>>
    %29 = vector.broadcast %28 : f32 to vector<16x128xf32>
    %30 = arith.mulf %26, %29 : vector<16x128xf32>
    %c2_18 = arith.constant 2 : index
    %31 = memref.load %arg5[%c2_18] : memref<6xf32, #tpu.memory_space<smem>>
    %32 = vector.broadcast %31 : f32 to vector<16x128xf32>
    %33 = arith.mulf %24, %32 : vector<16x128xf32>
    %34 = arith.addf %30, %33 : vector<16x128xf32>
    %c4_19 = arith.constant 4 : index
    %35 = memref.load %arg5[%c4_19] : memref<6xf32, #tpu.memory_space<smem>>
    %36 = vector.broadcast %35 : f32 to vector<16x128xf32>
    %37 = arith.mulf %27, %36 : vector<16x128xf32>
    %38 = arith.addf %34, %37 : vector<16x128xf32>
    %c0_20 = arith.constant 0 : index
    %39 = memref.load %arg6[%c0_20] : memref<1xf32, #tpu.memory_space<smem>>
    %40 = vector.broadcast %39 : f32 to vector<16x128xf32>
    %41 = arith.addf %38, %40 : vector<16x128xf32>
    %cst_21 = arith.constant 4.000000e-01 : f32
    %42 = vector.broadcast %cst_21 : f32 to vector<16x128xf32>
    %43 = arith.mulf %42, %41 : vector<16x128xf32>
    %44 = arith.maximumf %41, %43 : vector<16x128xf32>
    %c0_22 = arith.constant 0 : index
    %c0_23 = arith.constant 0 : index
    %c0_24 = arith.constant 0 : index
    %c0_25 = arith.constant 0 : index
    %45 = vector.load %arg7[%c0_22, %c0_23, %c0_24, %c0_25] : memref<1x4x16x128xf32, #tpu.memory_space<vmem>>, vector<1x1x16x128xf32>
    %46 = vector.shape_cast %45 : vector<1x1x16x128xf32> to vector<16x128xf32>
    %47 = vector.shape_cast %44 : vector<16x128xf32> to vector<1x1x16x128xf32>
    tpu.vector_store %arg7[%c0_22, %c0_23, %c0_24, %c0_25], %47 {strides = array<i32>} : memref<1x4x16x128xf32, #tpu.memory_space<vmem>>, vector<1x1x16x128xf32>,
    %c1 = arith.constant 1 : index
    %48 = memref.load %arg5[%c1] : memref<6xf32, #tpu.memory_space<smem>>
    %49 = vector.broadcast %48 : f32 to vector<16x128xf32>
    %50 = arith.mulf %26, %49 : vector<16x128xf32>
    %c3 = arith.constant 3 : index
    %51 = memref.load %arg5[%c3] : memref<6xf32, #tpu.memory_space<smem>>
    %52 = vector.broadcast %51 : f32 to vector<16x128xf32>
    %53 = arith.mulf %24, %52 : vector<16x128xf32>
    %54 = arith.addf %50, %53 : vector<16x128xf32>
    %c5 = arith.constant 5 : index
    %55 = memref.load %arg5[%c5] : memref<6xf32, #tpu.memory_space<smem>>
    %56 = vector.broadcast %55 : f32 to vector<16x128xf32>
    %57 = arith.mulf %27, %56 : vector<16x128xf32>
    %58 = arith.addf %54, %57 : vector<16x128xf32>
    %c0_26 = arith.constant 0 : index
    %59 = memref.load %arg6[%c0_26] : memref<1xf32, #tpu.memory_space<smem>>
    %60 = vector.broadcast %59 : f32 to vector<16x128xf32>
    %61 = arith.addf %58, %60 : vector<16x128xf32>
    %cst_27 = arith.constant 4.000000e-01 : f32
    %62 = vector.broadcast %cst_27 : f32 to vector<16x128xf32>
    %63 = arith.mulf %62, %61 : vector<16x128xf32>
    %64 = arith.maximumf %61, %63 : vector<16x128xf32>
    %c0_28 = arith.constant 0 : index
    %c1_29 = arith.constant 1 : index
    %c0_30 = arith.constant 0 : index
    %c0_31 = arith.constant 0 : index
    %65 = vector.load %arg7[%c0_28, %c1_29, %c0_30, %c0_31] : memref<1x4x16x128xf32, #tpu.memory_space<vmem>>, vector<1x1x16x128xf32>
    %66 = vector.shape_cast %65 : vector<1x1x16x128xf32> to vector<16x128xf32>
    %67 = vector.shape_cast %64 : vector<16x128xf32> to vector<1x1x16x128xf32>
    tpu.vector_store %arg7[%c0_28, %c1_29, %c0_30, %c0_31], %67 {strides = array<i32>} : memref<1x4x16x128xf32, #tpu.memory_space<vmem>>, vector<1x1x16x128xf32>,
    %c1_32 = arith.constant 1 : index
    %68 = memref.load %arg3[%c1_32] : memref<6xf32, #tpu.memory_space<smem>>
    %69 = vector.broadcast %68 : f32 to vector<16x128xf32>
    %70 = arith.mulf %6, %69 : vector<16x128xf32>
    %c3_33 = arith.constant 3 : index
    %71 = memref.load %arg3[%c3_33] : memref<6xf32, #tpu.memory_space<smem>>
    %72 = vector.broadcast %71 : f32 to vector<16x128xf32>
    %73 = arith.mulf %4, %72 : vector<16x128xf32>
    %74 = arith.addf %70, %73 : vector<16x128xf32>
    %c5_34 = arith.constant 5 : index
    %75 = memref.load %arg3[%c5_34] : memref<6xf32, #tpu.memory_space<smem>>
    %76 = vector.broadcast %75 : f32 to vector<16x128xf32>
    %77 = arith.mulf %7, %76 : vector<16x128xf32>
    %78 = arith.addf %74, %77 : vector<16x128xf32>
    %c0_35 = arith.constant 0 : index
    %79 = memref.load %arg4[%c0_35] : memref<1xf32, #tpu.memory_space<smem>>
    %80 = vector.broadcast %79 : f32 to vector<16x128xf32>
    %81 = arith.addf %78, %80 : vector<16x128xf32>
    %cst_36 = arith.constant 4.000000e-01 : f32
    %82 = vector.broadcast %cst_36 : f32 to vector<16x128xf32>
    %83 = arith.mulf %82, %81 : vector<16x128xf32>
    %84 = arith.maximumf %81, %83 : vector<16x128xf32>
    %c8_37 = arith.constant 8 : index
    %c0_38 = arith.constant 0 : index
    %85 = vector.load %arg8[%c8_37, %c0_38] : memref<32x128xf32, #tpu.memory_space<vmem>>, vector<16x128xf32>
    tpu.vector_store %arg8[%c8_37, %c0_38], %84 {strides = array<i32>} : memref<32x128xf32, #tpu.memory_space<vmem>>, vector<16x128xf32>,
    %c9_39 = arith.constant 9 : index
    %c0_40 = arith.constant 0 : index
    %86 = vector.load %arg8[%c9_39, %c0_40] : memref<32x128xf32, #tpu.memory_space<vmem>>, vector<16x128xf32>
    %c7_41 = arith.constant 7 : index
    %c0_42 = arith.constant 0 : index
    %87 = vector.load %arg8[%c7_41, %c0_42] : memref<32x128xf32, #tpu.memory_space<vmem>>, vector<16x128xf32>
    %c0_43 = arith.constant 0 : index
    %88 = memref.load %arg5[%c0_43] : memref<6xf32, #tpu.memory_space<smem>>
    %89 = vector.broadcast %88 : f32 to vector<16x128xf32>
    %90 = arith.mulf %86, %89 : vector<16x128xf32>
    %c2_44 = arith.constant 2 : index
    %91 = memref.load %arg5[%c2_44] : memref<6xf32, #tpu.memory_space<smem>>
    %92 = vector.broadcast %91 : f32 to vector<16x128xf32>
    %93 = arith.mulf %84, %92 : vector<16x128xf32>
    %94 = arith.addf %90, %93 : vector<16x128xf32>
    %c4_45 = arith.constant 4 : index
    %95 = memref.load %arg5[%c4_45] : memref<6xf32, #tpu.memory_space<smem>>
    %96 = vector.broadcast %95 : f32 to vector<16x128xf32>
    %97 = arith.mulf %87, %96 : vector<16x128xf32>
    %98 = arith.addf %94, %97 : vector<16x128xf32>
    %c0_46 = arith.constant 0 : index
    %99 = memref.load %arg6[%c0_46] : memref<1xf32, #tpu.memory_space<smem>>
    %100 = vector.broadcast %99 : f32 to vector<16x128xf32>
    %101 = arith.addf %98, %100 : vector<16x128xf32>
    %cst_47 = arith.constant 4.000000e-01 : f32
    %102 = vector.broadcast %cst_47 : f32 to vector<16x128xf32>
    %103 = arith.mulf %102, %101 : vector<16x128xf32>
    %104 = arith.maximumf %101, %103 : vector<16x128xf32>
    %c0_48 = arith.constant 0 : index
    %c2_49 = arith.constant 2 : index
    %c0_50 = arith.constant 0 : index
    %c0_51 = arith.constant 0 : index
    %105 = vector.load %arg7[%c0_48, %c2_49, %c0_50, %c0_51] : memref<1x4x16x128xf32, #tpu.memory_space<vmem>>, vector<1x1x16x128xf32>
    %106 = vector.shape_cast %105 : vector<1x1x16x128xf32> to vector<16x128xf32>
    %107 = vector.shape_cast %104 : vector<16x128xf32> to vector<1x1x16x128xf32>
    tpu.vector_store %arg7[%c0_48, %c2_49, %c0_50, %c0_51], %107 {strides = array<i32>} : memref<1x4x16x128xf32, #tpu.memory_space<vmem>>, vector<1x1x16x128xf32>,
    %c1_52 = arith.constant 1 : index
    %108 = memref.load %arg5[%c1_52] : memref<6xf32, #tpu.memory_space<smem>>
    %109 = vector.broadcast %108 : f32 to vector<16x128xf32>
    %110 = arith.mulf %86, %109 : vector<16x128xf32>
    %c3_53 = arith.constant 3 : index
    %111 = memref.load %arg5[%c3_53] : memref<6xf32, #tpu.memory_space<smem>>
    %112 = vector.broadcast %111 : f32 to vector<16x128xf32>
    %113 = arith.mulf %84, %112 : vector<16x128xf32>
    %114 = arith.addf %110, %113 : vector<16x128xf32>
    %c5_54 = arith.constant 5 : index
    %115 = memref.load %arg5[%c5_54] : memref<6xf32, #tpu.memory_space<smem>>
    %116 = vector.broadcast %115 : f32 to vector<16x128xf32>
    %117 = arith.mulf %87, %116 : vector<16x128xf32>
    %118 = arith.addf %114, %117 : vector<16x128xf32>
    %c0_55 = arith.constant 0 : index
    %119 = memref.load %arg6[%c0_55] : memref<1xf32, #tpu.memory_space<smem>>
    %120 = vector.broadcast %119 : f32 to vector<16x128xf32>
    %121 = arith.addf %118, %120 : vector<16x128xf32>
    %cst_56 = arith.constant 4.000000e-01 : f32
    %122 = vector.broadcast %cst_56 : f32 to vector<16x128xf32>
    %123 = arith.mulf %122, %121 : vector<16x128xf32>
    %124 = arith.maximumf %121, %123 : vector<16x128xf32>
    %c0_57 = arith.constant 0 : index
    %c3_58 = arith.constant 3 : index
    %c0_59 = arith.constant 0 : index
    %c0_60 = arith.constant 0 : index
    %125 = vector.load %arg7[%c0_57, %c3_58, %c0_59, %c0_60] : memref<1x4x16x128xf32, #tpu.memory_space<vmem>>, vector<1x1x16x128xf32>
    %126 = vector.shape_cast %125 : vector<1x1x16x128xf32> to vector<16x128xf32>
    %127 = vector.shape_cast %124 : vector<16x128xf32> to vector<1x1x16x128xf32>
    tpu.vector_store %arg7[%c0_57, %c3_58, %c0_59, %c0_60], %127 {strides = array<i32>} : memref<1x4x16x128xf32, #tpu.memory_space<vmem>>, vector<1x1x16x128xf32>,
    return
  }
  func.func @transform_0(%arg0: i32, %arg1: i32) -> (i32, i32, i32) {
    %c0_i32 = arith.constant 0 : i32
    %c0_i32_0 = arith.constant 0 : i32
    return %arg0, %c0_i32, %arg1 : i32, i32, i32
  }
  func.func @transform_1(%arg0: i32, %arg1: i32) -> i32 {
    %c0_i32 = arith.constant 0 : i32
    %c0_i32_0 = arith.constant 0 : i32
    return %c0_i32 : i32
  }
  func.func @transform_2(%arg0: i32, %arg1: i32) -> i32 {
    %c0_i32 = arith.constant 0 : i32
    %c0_i32_0 = arith.constant 0 : i32
    return %c0_i32 : i32
  }
  func.func @transform_3(%arg0: i32, %arg1: i32) -> i32 {
    %c0_i32 = arith.constant 0 : i32
    %c0_i32_0 = arith.constant 0 : i32
    return %c0_i32 : i32
  }
  func.func @transform_4(%arg0: i32, %arg1: i32) -> i32 {
    %c0_i32 = arith.constant 0 : i32
    %c0_i32_0 = arith.constant 0 : i32
    return %c0_i32 : i32
  }
  func.func @transform_5(%arg0: i32, %arg1: i32) -> (i32, i32, i32, i32) {
    %c0_i32 = arith.constant 0 : i32
    %c0_i32_0 = arith.constant 0 : i32
    %c0_i32_1 = arith.constant 0 : i32
    return %arg0, %c0_i32, %c0_i32_0, %arg1 : i32, i32, i32, i32
  }
}

</mosaic_0001>

<bundles_post_ra>
// kernel: tpu_custom_call.1
= control target key start
LH: loop header
LB: loop body
LE: loop exit
PB: predicated region body
PF: predicated region fallthrough
CT: control target
= control target key end

     0   :  { %s1178_s0 = inlined_call_operand.hbm [shape: f32[2,16,128], index: 0, kind: input, shape index: {}]   ;;  %s1179_s1 = inlined_call_operand.vmem [shape: f32[6], index: 1, kind: input, shape index: {}]   ;;  %s1180_s2 = inlined_call_operand.<no memory space> [shape: f32[1], index: 2, kind: input, shape index: {}]   ;;  %s1181_s3 = inlined_call_operand.vmem [shape: f32[6], index: 3, kind: input, shape index: {}]   ;;  %s1182_s4 = inlined_call_operand.<no memory space> [shape: f32[1], index: 4, kind: input, shape index: {}]   ;;  %s1183_s5 = inlined_call_operand.hbm [shape: f32[2,4,16,128], index: 5, kind: output, shape index: {}]  }
   0x1   :  { %10 = sst [smem:[#allocation3]] %s1180_s2 }
   0x2   :  { %11 = sst [smem:[#allocation4]] %s1182_s4 }
   0x3   :  { %12 = vsyncpa [#allocation6], 0 }
   0x4   :  { %14 = vsyncpa [#allocation6 + $0x1], 0 }
   0x5   :  { %15 = vsyncpa [#allocation8], 0 }
   0x6   :  { %16 = vsyncpa [#allocation11], 0 }
   0x7   :  { %17 = vsyncpa [#allocation7], 0 }
   0x8   :  { %19 = vsyncpa [#allocation7 + $0x1], 0  ;;  %s915_s22 = smov 0   ;;  %s917_s23 = smov 0  }
   0x9   :  { %s919_s24 = smov 0   ;;  %s921_s25 = smov 0  }
   0xa   :  { %s923_s26 = smov 0   ;;  %s925_s2 = smov 0  }
   0xb LB: > { %s588_s4 = sadd.s32 4294967295, %s868_s2   ;;  %s589_s27 = sadd.s32 4294967294, %s868_s2   ;;  %s868_s2 = sphi %s925_s2, %s25_s2   ;;  %s864_s26 = sphi %s923_s26, %s1209_s26   ;;  %s860_s25 = sphi %s921_s25, %s1208_s25   ;;  %s856_s24 = sphi %s919_s24, %s1207_s24   ;;  %s852_s23 = sphi %s917_s23, %s1206_s23   ;;  %s848_s22 = sphi %s915_s22, %s1205_s22  }
   0xc   : > { %s46_s28 = sadd.s32 1, %s856_s24  ;;  %p53_p0 = scmp.ne.s32.totalorder %s856_s24, %s852_s23 }
   0xd   : > { %p54_p1 = scmp.eq.s32.totalorder %s868_s2, 0  ;;  %p59_p2 = scmp.ne.s32.totalorder %s852_s23, %s848_s22 }
   0xe   : > { %p953_p3 = scmp.eq.s32.totalorder %s588_s4, 0  ;;  %p169_p4 = scmp.eq.s32.totalorder %s588_s4, 1 }
   0xf   : > { %p957_p5 = por %p54_p1, %p53_p0  ;;  %p175_p6 = scmp.eq.s32.totalorder %s589_s27, 1 }
  0x10   : > { %s1190_s29 = scalar_select %p953_p3, 1, 0 }
  0x11   : > { %p963_p7 = por %p953_p3, %p59_p2  ;;  %p967_p8 = por %p169_p4, %p53_p0 }
  0x12   : > { %p971_p9 = por %p175_p6, %p59_p2  ;;  %p590_p10 = scmp.ge.s32.totalorder %s868_s2, 1 }
  0x13   : > { %s1192_s6 = scalar_select %p963_p7, 1, 0 }
  0x14   : > { %s1193_s7 = scalar_select %p967_p8, 1, 0 }
  0x15   : > { %s1194_s8 = scalar_select %p971_p9, 1, 0 }
  0x16   : > { %p182_p11 = scmp.lt.s32.totalorder %s868_s2, 3  ;;  %s195_s11 = sshll.u32 %s1179_s1, 4  ;;  %s196_s11 = int_to_ptr.vmem [resolvable:$true] %s195_s11 }
  0x17   : > { %p659_p0 = scmp.lt.s32.totalorder %s868_s2, 2  ;;  %s209_s15 = sshll.u32 %s1181_s3, 4  ;;  %s210_s15 = int_to_ptr.vmem [resolvable:$true] %s209_s15 }
  0x18   : > { %p980_p12 = pnand %p590_p10, %p182_p11  ;;  %s718_s18 = scalar_lea.vmem %s196_s11, 16 }
  0x19   : > { %p993_p2 = pnand %p659_p0, %p957_p5  ;;  %p719_p6 = scmp.ne.s32.totalorder %s196_s11, %s718_s18 }
  0x1a   : > { %s1195_s12 = scalar_select %p980_p12, 1, 0 }
  0x1b   : > { %p642_p1 = pneg %p980_p12  ;;  %p726_p9 = scmp.lt.s32.totalorder %s196_s11, %s196_s11 }
  0x1c   : > { %s1196_s16 = scalar_select %p993_p2, 1, 0 }
  0x1d   : > { %p999_p4 = pnand %p642_p1, %p953_p3  ;;  %p727_p8 = scmp.lt.s32.totalorder %s718_s18, %s718_s18 }
  0x1f   : > { %p720_p10 = pneg %p999_p4  ;;  %p728_p7 = por %p727_p8, %p726_p9 }
  0x21   : > { %p721_p11 = pnand %p720_p10, %p719_p6 }
  0x23   : > { %p722_p13 = pneg %p721_p11 }
  0x25   : > { %p729_p5 = pnand %p728_p7, %p722_p13 }
  0x27   : > { %732 = shalt.err (!%p729_p5)
}
  0x28   : > { %s870_s19 = smov [#allocation9]   ;;  %s733_s20 = scalar_lea.vmem %s210_s15, 16 }
  0x29   : > { %645 = dma.vmem_to_smem (!%p999_p4), %s196_s11, 16, %s870_s19, [#allocation8]  }
  0x2a   : > { %p734_p0 = scmp.ne.s32.totalorder %s210_s15, %s733_s20  ;;  %p741_p12 = scmp.lt.s32.totalorder %s210_s15, %s210_s15 }
  0x2b   : > { %p742_p2 = scmp.lt.s32.totalorder %s733_s20, %s733_s20 }
  0x2c   : > { %p736_p1 = pnand %p734_p0, %p720_p10 }
  0x2d   : > { %p743_p6 = por %p742_p2, %p741_p12 }
  0x2e   : > { %p737_p3 = pneg %p736_p1 }
  0x30   : > { %p744_p11 = pnand %p743_p6, %p737_p3 }
  0x32   : > { %747 = shalt.err (!%p744_p11)
}
  0x33   : > { %s871_s21 = smov [#allocation10]   ;;  %s37_s4 = sadd.s32 1, %s864_s26 }
  0x34   : > { %648 = dma.vmem_to_smem (!%p999_p4), %s210_s15, 16, %s871_s21, [#allocation11]  }
  0x35   : > { %s223_s27 = sand.u32 1, %s856_s24   ;;  %p39_p7 = scmp.ge.s32.totalorder %s37_s4, 2 }
  0x36   : > { %s594_s30 = sshll.u32 %s223_s27, 4  ;;  %s628_s9 = sshll.u32 %s864_s26, 8 }
  0x37   : > { %s1211_s4 = smov (%p39_p7, %s37_s4), 0  ;;  %s1017_s13 = scalar_lea.hbm %s1178_s0, %s628_s9 }
  0x38   : > { %s41_s14 = ssub.s32 %s864_s26, %s1211_s4  ;;  %s227_s15 = scalar_lea.vmem [#allocation5], %s594_s30 }
  0x39   : > { %s235_s17 = sshll.u32 %s227_s15, 4  ;;  %p44_p3 = scmp.eq.s32.totalorder %s41_s14, 0  ;;  %s1021_s17 = int_to_ptr.vmem [resolvable:$true] %s235_s17 }
  0x3a   : > { %s1028_s19 = scalar_lea.sflag [#allocation6], %s223_s27  ;;  %s748_s20 = scalar_lea.hbm %s1017_s13, 256 }
  0x3b   : > { %s1026_s18 = scalar_select %p44_p3, %s856_s24, %s46_s28  }
  0x3c   : > { %p749_p8 = scmp.ne.s32.totalorder %s1017_s13, %s748_s20  ;;  %p1198_p9 = scmp.ne.s32.totalorder %s1196_s16, 0 }
  0x3d   : > { %s753_s30 = scalar_lea.hbm %s1178_s0, 512  ;;  %p754_p4 = scmp.lt.u32.totalorder %s1017_s13, %s1178_s0 }
  0x3e   : > { %p750_p12 = pneg %p1198_p9  ;;  %p755_p10 = scmp.lt.u32.totalorder %s753_s30, %s748_s20 }
  0x3f   : > { %p757_p0 = scmp.lt.u32.totalorder %s748_s20, %s1017_s13 }
  0x40   : > { %p751_p13 = pnand %p750_p12, %p749_p8  ;;  %p756_p5 = por %p755_p10, %p754_p4 }
  0x42   : > { %p752_p2 = pneg %p751_p13  ;;  %p758_p1 = por %p757_p0, %p756_p5 }
  0x44   : > { %p759_p6 = pnand %p758_p1, %p752_p2 }
  0x46   : > { %762 = shalt.err (!%p759_p6)
}
  0x47   : > { %s763_s28 = scalar_lea.vmem %s1021_s17, 256  ;;  %s872_s27 = smov [#allocation5]  }
  0x48   : > { %p764_p11 = scmp.ne.s32.totalorder %s1021_s17, %s763_s28  ;;  %s768_s14 = sshll.u32 %s872_s27, 4  ;;  %s769_s14 = int_to_ptr.vmem [resolvable:$false] %s768_s14 }
  0x49   : > { %s770_s15 = scalar_lea.vmem %s769_s14, 512  ;;  %p771_p8 = scmp.lt.s32.totalorder %s1021_s17, %s769_s14 }
  0x4a   : > { %p766_p7 = pnand %p764_p11, %p750_p12  ;;  %p772_p13 = scmp.lt.s32.totalorder %s770_s15, %s763_s28 }
  0x4c   : > { %p767_p3 = pneg %p766_p7  ;;  %p773_p4 = por %p772_p13, %p771_p8 }
  0x4e   : > { %p774_p10 = pnand %p773_p4, %p767_p3 }
  0x50   : > { %777 = shalt.err (!%p774_p10)
}
  0x51   : > { %s873_s20 = smov 128   ;;  %s874_s21 = smov 8  }
  0x52   : > { %652 = dma.hbm_to_vmem [thread:$0]  (!%p1198_p9), %s1017_s13, 256, %s1021_s17, %s1028_s19, %s873_s20, %s873_s20, %s874_s21  }
  0x53   : > { %p1199_p12 = scmp.ne.s32.totalorder %s1195_s12, 0 }
  0x54   : > { %s1059_s9 = sand.u32 (!%p1199_p12), 1, %s852_s23   ;;  %p1200_p2 = scmp.ne.s32.totalorder (!%p1199_p12), %s1192_s6, 0 }
  0x55   : > { %247 = sbr.rel (%p1199_p12) target bundleno = 171 (0xab), region = 40  ;;  %s598_s30 = sshll.u32 (!%p1199_p12), %s1059_s9, 4 }
  0x56   : > { %s250_s10 = scalar_lea.sflag (!%p1199_p12), [#allocation6], %s1059_s9  ;;  %s253_s11 = scalar_lea.vmem (!%p1199_p12), [#allocation5], %s598_s30 }
  0x5c   : > { %831 = dma.done.wait (%p1200_p2), %s250_s10, 256  }
  0x5d   : > { %833 = vsyncadd (%p1200_p2), %s250_s10, 4294967040  ;;  %p1201_p5 = scmp.ne.s32.totalorder %s1190_s29, 0 }
  0x5f   : > { %835 = dma.done.wait (%p1201_p5), [#allocation8], 16  }
  0x60   : > { %837 = vsyncadd (%p1201_p5), [#allocation8], 4294967280 }
  0x61   : > { %839 = dma.done.wait (%p1201_p5), [#allocation11], 16  }
  0x62   : > { %841 = vsyncadd (%p1201_p5), [#allocation11], 4294967280 }
  0x63   : > { %266 = sfence }
  0x64   : > { %v291_v0 = vld [vmem:[%s253_s11] sm:$0xff]  ;;  %s602_s12 = sld [smem:[#allocation9 + $0x2]]  ;;  %s612_s16 = sld [smem:[#allocation9 + $0x3]]  ;;  %v875_v1 = vmov 0.0   ;;  %v292_v2 = vld [vmem:[%s253_s11 + $0x8] sm:$0xff] }
  0x65   : > { %289 = vst [vmem:[#allocation2] sm:$0xff] %v875_v1  ;;  %290 = vst [vmem:[#allocation2 + $0x18] sm:$0xff] %v875_v1  ;;  %s299_s6 = sld [smem:[#allocation9]]  ;;  %s603_s13 = sld [smem:[#allocation9 + $0x4]] }
  0x66   : > { %293 = vst [vmem:[#allocation2 + $0x8] sm:$0xff] %v291_v0  ;;  %294 = vst [vmem:[#allocation2 + $0x10] sm:$0xff] %v292_v2  ;;  %s1075_s17 = sld [smem:[#allocation9 + $0x5]]  ;;  %s611_s19 = sld [smem:[#allocation9 + $0x1]] }
  0x67   : > { %s315_s28 = sld [smem:[#allocation3]]  ;;  %s604_s27 = sld [smem:[#allocation10 + $0x2]] }
  0x68   : > { %s329_s29 = sld [smem:[#allocation10]]  ;;  %s606_s14 = sld [smem:[#allocation10 + $0x1]] }
  0x69   : > { %s607_s15 = sld [smem:[#allocation10 + $0x3]]  ;;  %s605_s20 = sld [smem:[#allocation10 + $0x4]] }
  0x6a   : > { %v304_v3 = vstv %s602_s12  ;;  %v387_v4 = vstv %s612_s16  ;;  %s345_s21 = sld [smem:[#allocation4]]  ;;  %s608_s30 = sld [smem:[#allocation10 + $0x5]] }
  0x6b   : > { %v305_v5 = vmul.f32 %v304_v3, %v291_v0  ;;  %v306_v6 = vmul.f32 %v304_v3, %v292_v2  ;;  %v300_v8 = vstv %s299_s6  ;;  %v388_v9 = vmul.f32 %v387_v4, %v291_v0  ;;  %s601_s10 = sshll.u32 %s1059_s9, 6  ;;  %s629_s16 = sshll.u32 %s860_s25, 10 }
  0x6c   : > { %v389_v10 = vmul.f32 %v387_v4, %v292_v2  ;;  %v310_v13 = vstv %s603_s13  ;;  %v383_v15 = vstv %s611_s19  ;;  %v393_v18 = vstv %s1075_s17  ;;  %s1103_s11 = scalar_lea.vmem [#allocation12], %s601_s10  ;;  %s1127_s17 = scalar_lea.hbm %s1183_s5, %s629_s16 }
  0x6d   : > { %v297_v7 = vld [vmem:[#allocation2 + $0x7] sm:$0xff]  ;;  %v298_v12 = vld [vmem:[#allocation2 + $0xf] sm:$0xff]  ;;  %v316_v25 = vstv %s315_s28  ;;  %v334_v45 = vstv %s604_s27  ;;  %s481_s12 = sshll.u32 %s1103_s11, 4  ;;  %s467_s25 = scalar_lea.sflag [#allocation7], %s1059_s9  ;;  %s1120_s12 = int_to_ptr.vmem [resolvable:$true] %s481_s12 }
  0x6e   : > { %v295_v11 = vld [vmem:[#allocation2 + $0x9] sm:$0xff]  ;;  %v296_v14 = vld [vmem:[#allocation2 + $0x11] sm:$0xff]  ;;  %v311_v22 = vmul.f32 %v310_v13, %v297_v7  ;;  %v312_v23 = vmul.f32 %v310_v13, %v298_v12  ;;  %v394_v29 = vmul.f32 %v393_v18, %v297_v7  ;;  %v395_v31 = vmul.f32 %v393_v18, %v298_v12  ;;  %s778_s19 = scalar_lea.vmem %s1120_s12, 1024  ;;  %p1202_p0 = scmp.ne.s32.totalorder %s1193_s7, 0 }
  0x6f   : > { %v301_v16 = vmul.f32 %v300_v8, %v295_v11  ;;  %v302_v17 = vmul.f32 %v300_v8, %v296_v14  ;;  %v384_v19 = vmul.f32 %v383_v15, %v295_v11  ;;  %v385_v20 = vmul.f32 %v383_v15, %v296_v14  ;;  %p779_p9 = scmp.ne.s32.totalorder %s1120_s12, %s778_s19  ;;  %s876_s28 = smov [#allocation12]  }
  0x70   : > { %v330_v44 = vstv %s329_s29  ;;  %v1078_v46 = vstv %s606_s14  ;;  %v1080_v47 = vstv %s607_s15  ;;  %v340_v53 = vstv %s605_s20  ;;  %s782_s29 = sshll.u32 %s876_s28, 4  ;;  %s783_s29 = int_to_ptr.vmem [resolvable:$false] %s782_s29 }
  0x71   : > { %v307_v21 = vadd.f32 %v305_v5, %v301_v16  ;;  %v308_v24 = vadd.f32 %v306_v6, %v302_v17  ;;  %v390_v26 = vadd.f32 %v388_v9, %v384_v19  ;;  %v391_v27 = vadd.f32 %v389_v10, %v385_v20  ;;  %p780_p1 = pnand %p779_p9, %p1202_p0  ;;  %s784_s27 = scalar_lea.vmem %s783_s29, 2048 }
  0x72   : > { %v1084_v54 = vstv %s345_s21  ;;  %v1086_v55 = vstv %s608_s30  ;;  %p785_p11 = scmp.lt.s32.totalorder %s1120_s12, %s783_s29  ;;  %p786_p7 = scmp.lt.s32.totalorder %s784_s27, %s778_s19 }
  0x73   : > { %v313_v28 = vadd.f32 %v311_v22, %v307_v21  ;;  %v314_v30 = vadd.f32 %v312_v23, %v308_v24  ;;  %v396_v34 = vadd.f32 %v394_v29, %v390_v26  ;;  %v397_v35 = vadd.f32 %v395_v31, %v391_v27  ;;  %p781_p6 = pneg %p780_p1 }
  0x74   : > { %p787_p3 = por %p786_p7, %p785_p11 }
  0x75   : > { %v317_v32 = vadd.f32 %v316_v25, %v313_v28  ;;  %v318_v33 = vadd.f32 %v316_v25, %v314_v30  ;;  %v400_v40 = vadd.f32 %v396_v34, %v316_v25  ;;  %v401_v41 = vadd.f32 %v397_v35, %v316_v25 }
  0x76   : > { %p788_p8 = pnand %p787_p3, %p781_p6 }
  0x77   : > { %v319_v36 = vmul.f32 0.4, %v317_v32  ;;  %v320_v37 = vmul.f32 0.4, %v318_v33  ;;  %v402_v42 = vmul.f32 0.4, %v400_v40 }
  0x78   : > { %v403_v43 = vmul.f32 0.4, %v401_v41 }
  0x79   : > { %v321_v38 = vmax.f32 %v317_v32, %v319_v36  ;;  %v322_v39 = vmax.f32 %v318_v33, %v320_v37  ;;  %v404_v48 = vmax.f32 %v400_v40, %v402_v42 }
  0x7a   : > { %v1082_v49 = vmax.f32 %v401_v41, %v403_v43 }
  0x7b   : > { %323 = vst [vmem:[#allocation2 + $0x8] sm:$0xff] %v321_v38  ;;  %324 = vst [vmem:[#allocation2 + $0x10] sm:$0xff] %v322_v39  ;;  %v335_v58 = vmul.f32 %v334_v45, %v321_v38  ;;  %v361_v60 = vmul.f32 %v1080_v47, %v321_v38  ;;  %v336_v62 = vmul.f32 %v334_v45, %v322_v39 }
  0x7c   : > { %v362_v0 = vmul.f32 %v1080_v47, %v322_v39  ;;  %v418_v18 = vmul.f32 %v404_v48, %v334_v45  ;;  %v419_v19 = vmul.f32 %v1082_v49, %v334_v45  ;;  %v445_v25 = vmul.f32 %v404_v48, %v1080_v47 }
  0x7d   : > { %v446_v42 = vmul.f32 %v1082_v49, %v1080_v47 }
  0x82   : > { %v325_v50 = vld [vmem:[#allocation2 + $0x9] sm:$0xff]  ;;  %v326_v56 = vld [vmem:[#allocation2 + $0x11] sm:$0xff] }
  0x83   : > { %v327_v51 = vld [vmem:[#allocation2 + $0x7] sm:$0xff]  ;;  %v328_v52 = vld [vmem:[#allocation2 + $0xf] sm:$0xff]  ;;  %v331_v57 = vmul.f32 %v330_v44, %v325_v50  ;;  %v357_v59 = vmul.f32 %v1078_v46, %v325_v50  ;;  %v332_v61 = vmul.f32 %v330_v44, %v326_v56  ;;  %v358_v63 = vmul.f32 %v1078_v46, %v326_v56 }
  0x84   : > { %406 = vst [vmem:[#allocation2 + $0x8] sm:$0xff] %v404_v48  ;;  %407 = vst [vmem:[#allocation2 + $0x10] sm:$0xff] %v1082_v49  ;;  %v341_v2 = vmul.f32 %v340_v53, %v327_v51  ;;  %v367_v4 = vmul.f32 %v1086_v55, %v327_v51  ;;  %v342_v6 = vmul.f32 %v340_v53, %v328_v52 }
  0x85   : > { %v337_v1 = vadd.f32 %v335_v58, %v331_v57  ;;  %v363_v3 = vadd.f32 %v361_v60, %v357_v59  ;;  %v338_v5 = vadd.f32 %v336_v62, %v332_v61  ;;  %v364_v7 = vadd.f32 %v362_v0, %v358_v63 }
  0x86   : > { %v368_v8 = vmul.f32 %v1086_v55, %v328_v52 }
  0x87   : > { %v343_v9 = vadd.f32 %v341_v2, %v337_v1  ;;  %v369_v10 = vadd.f32 %v367_v4, %v363_v3  ;;  %v344_v11 = vadd.f32 %v342_v6, %v338_v5 }
  0x88   : > { %v370_v12 = vadd.f32 %v368_v8, %v364_v7 }
  0x89   : > { %v347_v13 = vadd.f32 %v1084_v54, %v343_v9  ;;  %v373_v14 = vadd.f32 %v369_v10, %v1084_v54  ;;  %v348_v15 = vadd.f32 %v1084_v54, %v344_v11 }
  0x8a   : > { %v374_v16 = vadd.f32 %v370_v12, %v1084_v54 }
  0x8b   : > { %v410_v17 = vld [vmem:[#allocation2 + $0x7] sm:$0xff]  ;;  %v349_v20 = vmul.f32 0.4, %v347_v13  ;;  %v375_v21 = vmul.f32 0.4, %v373_v14  ;;  %v409_v24 = vld [vmem:[#allocation2 + $0x11] sm:$0xff] }
  0x8c   : > { %v408_v22 = vld [vmem:[#allocation2 + $0x9] sm:$0xff]  ;;  %v424_v23 = vmul.f32 %v410_v17, %v340_v53  ;;  %v350_v26 = vmul.f32 0.4, %v348_v15  ;;  %v376_v27 = vmul.f32 0.4, %v374_v16  ;;  %v415_v30 = vmul.f32 %v409_v24, %v330_v44 }
  0x8d   : > { %v414_v28 = vmul.f32 %v408_v22, %v330_v44  ;;  %v411_v29 = vld [vmem:[#allocation2 + $0xf] sm:$0xff]  ;;  %v351_v31 = vmax.f32 %v347_v13, %v349_v20  ;;  %v377_v32 = vmax.f32 %v373_v14, %v375_v21  ;;  %v441_v34 = vmul.f32 %v408_v22, %v1078_v46 }
  0x8e   : > { %v425_v33 = vmul.f32 %v411_v29, %v340_v53  ;;  %v352_v35 = vmax.f32 %v348_v15, %v350_v26  ;;  %v378_v36 = vmax.f32 %v374_v16, %v376_v27  ;;  %v421_v38 = vadd.f32 %v419_v19, %v415_v30 }
  0x8f   : > { %v420_v37 = vadd.f32 %v418_v18, %v414_v28  ;;  %353 = vst [vmem:[%s1103_s11] sm:$0xff] %v351_v31  ;;  %609 = vst [vmem:[%s1103_s11 + $0x10] sm:$0xff] %v377_v32  ;;  %v447_v39 = vadd.f32 %v445_v25, %v441_v34  ;;  %v451_v40 = vmul.f32 %v410_v17, %v1086_v55 }
  0x90   : > { %v442_v41 = vmul.f32 %v409_v24, %v1078_v46  ;;  %354 = vst [vmem:[%s1103_s11 + $0x8] sm:$0xff] %v352_v35  ;;  %610 = vst [vmem:[%s1103_s11 + $0x18] sm:$0xff] %v378_v36  ;;  %v427_v44 = vadd.f32 %v425_v33, %v421_v38  ;;  %v452_v50 = vmul.f32 %v411_v29, %v1086_v55 }
  0x91   : > { %v426_v43 = vadd.f32 %v424_v23, %v420_v37  ;;  %v453_v45 = vadd.f32 %v451_v40, %v447_v39 }
  0x92   : > { %v448_v48 = vadd.f32 %v446_v42, %v442_v41  ;;  %v431_v52 = vadd.f32 %v427_v44, %v1084_v54 }
  0x93   : > { %v430_v51 = vadd.f32 %v426_v43, %v1084_v54  ;;  %v457_v46 = vadd.f32 %v453_v45, %v1084_v54 }
  0x94   : > { %v454_v53 = vadd.f32 %v452_v50, %v448_v48  ;;  %v433_v49 = vmul.f32 0.4, %v431_v52 }
  0x95   : > { %v432_v47 = vmul.f32 0.4, %v430_v51  ;;  %v459_v56 = vmul.f32 0.4, %v457_v46 }
  0x96   : > { %v458_v57 = vadd.f32 %v454_v53, %v1084_v54  ;;  %v435_v58 = vmax.f32 %v431_v52, %v433_v49 }
  0x97   : > { %v434_v55 = vmax.f32 %v430_v51, %v432_v47  ;;  %v461_v59 = vmax.f32 %v457_v46, %v459_v56 }
  0x98   : > { %v460_v60 = vmul.f32 0.4, %v458_v57  ;;  %617 = vst [vmem:[%s1103_s11 + $0x28] sm:$0xff] %v435_v58 }
  0x99   : > { %616 = vst [vmem:[%s1103_s11 + $0x20] sm:$0xff] %v434_v55  ;;  %621 = vst [vmem:[%s1103_s11 + $0x30] sm:$0xff] %v461_v59 }
  0x9a   : > { %v462_v54 = vmax.f32 %v458_v57, %v460_v60 }
  0x9c   : > { %622 = vst [vmem:[%s1103_s11 + $0x38] sm:$0xff] %v462_v54 }
  0x9d   : > { %791 = shalt.err (!%p788_p8)
}
  0x9e   : > { %s792_s14 = scalar_lea.hbm %s1127_s17, 1024  ;;  %s796_s21 = scalar_lea.hbm %s1183_s5, 2048 }
  0x9f   : > { %p793_p13 = scmp.ne.s32.totalorder %s1127_s17, %s792_s14  ;;  %p797_p12 = scmp.lt.u32.totalorder %s1127_s17, %s1183_s5 }
  0xa0   : > { %p798_p2 = scmp.lt.u32.totalorder %s796_s21, %s792_s14  ;;  %p800_p9 = scmp.lt.u32.totalorder %s792_s14, %s1127_s17 }
  0xa1   : > { %p794_p4 = pnand %p793_p13, %p1202_p0 }
  0xa2   : > { %p799_p5 = por %p798_p2, %p797_p12 }
  0xa3   : > { %p795_p10 = pneg %p794_p4 }
  0xa4   : > { %p801_p1 = por %p800_p9, %p799_p5 }
  0xa6   : > { %p802_p6 = pnand %p801_p1, %p795_p10 }
  0xa8   : > { %805 = shalt.err (!%p802_p6)
}
  0xa9   : > { %s877_s11 = smov 128   ;;  %s878_s16 = smov 8  }
  0xaa   : > { %640 = dma.vmem_to_hbm [thread:$0]  (%p1202_p0), %s1120_s12, 1024, %s1127_s17, %s467_s25, %s877_s11, %s877_s11, %s878_s16  }
  0xab PF: > { %s496_s6 = sand.u32 1, %s848_s22   ;;  %p1203_p11 = scmp.ne.s32.totalorder %s1194_s8, 0 }
  0xac   : > { %p1204_p7 = scmp.ge.s32.totalorder %s868_s2, 2  ;;  %s497_s13 = scalar_lea.sflag [#allocation7], %s496_s6 }
  0xae   : > { %p654_p3 = pnand %p1204_p7, %p1203_p11 }
  0xb0   : > { %843 = dma.done.wait (!%p654_p3), %s497_s13, 1024  }
  0xb1   : > { %845 = vsyncadd (!%p654_p3), %s497_s13, 4294966272  ;;  %s25_s2 = sadd.s32 1, %s868_s2   ;;  %s1205_s22 = smov %s852_s23 }
  0xb2   : > { %p22_p8 = scmp.ge.s32.totalorder %s25_s2, 4   ;;  %s1206_s23 = smov %s856_s24 }
  0xb3   : > { %s1207_s24 = smov %s1026_s18  ;;  %s1208_s25 = smov %s864_s26 }
  0xb4   : > { %s1209_s26 = smov %s1211_s4  ;;  %24 = sbr.rel (!%p22_p8) target bundleno = 11 (0xb), region = 97 }
  0xbb   :  { %502 = vsyncpa [#allocation6], 1 }
  0xbc   :  { %504 = vsyncpa [#allocation6 + $0x1], 1 }
  0xbd   :  { %505 = vsyncpa [#allocation7], 1 }
  0xbe   :  { %507 = vsyncpa [#allocation7 + $0x1], 1 }
  0xbf   :  { %508 = vsyncpa [#allocation8], 1 }
  0xc0   :  { %510 = vsyncpa [#allocation8 + $0x1], 1 }
  0xc1   :  { %511 = vsyncpa [#allocation11], 1 }

</bundles_post_ra>
